<compile_context>
chip_gen: v6e
topology: v6e:2x2x1
jax: 0.10.0
libtpu: 0.0.40
codegen_flags: <defaults>
</compile_context>

<pallas_src>
import functools

import jax
import jax.numpy as jnp
from jax import lax
from jax.experimental import pallas as pl
from jax.experimental.pallas import tpu as pltpu


# ---------------------------------------------------------------------------
# Pallas kernel: fully fused k-means loop (KmeansUnitspaceV2 iterations)
# ---------------------------------------------------------------------------
def _make_kmeans_kernel(N, D, K, K_pad, max_iter, tol=1e-5):
    def kernel(xb_ref, xt_ref, p0_ref, p_ref, done_ref):
        # xb_ref: (N, D)      bf16   x (cast once outside)      -> sim matmul LHS
        # xt_ref: (D, N)      f32    x transposed (once outside)-> update matmul LHS
        # p0_ref: (D, K_pad)  f32    initial prototypes, transposed, pad cols = 0
        # p_ref : (D, K_pad)  f32    running prototypes (output, resident in VMEM)
        # done_ref: (1,) int32 SMEM  convergence flag
        p_ref[...] = p0_ref[...]
        done_ref[0] = jnp.int32(0)

        # hoisted loop-invariants (JAX does not CSE broadcast_in_dim)
        col = lax.broadcasted_iota(jnp.int32, (N, K_pad), 1)
        pad_mask = col >= K                       # padded prototype columns
        neg_big = jnp.float32(-3.0e38)            # below any real similarity
        inv_kd = jnp.float32(1.0 / (K * D))       # mean over real K*D entries

        def body(i, carry):
            @pl.when(done_ref[0] == 0)
            def _():
                pT = p_ref[...]                                   # (D, K_pad) f32

                # F.normalize(prototypes) folded into a per-column scale of sim
                # (eps=1e-12 -> rsqrt(max(sumsq, 1e-24))); x normalization is
                # dropped: argmax per row is invariant to a positive row scale.
                p_sumsq = jnp.sum(pT * pT, axis=0, keepdims=True)  # (1, K_pad)
                col_scale = lax.rsqrt(jnp.maximum(p_sumsq, 1e-24))

                # sim = x @ p^T : plain NN bf16 matmul, f32 accumulation.
                sim = jnp.dot(xb_ref[...], pT.astype(jnp.bfloat16),
                              preferred_element_type=jnp.float32)  # (N, K_pad)
                sim = sim * col_scale
                sim = jnp.where(pad_mask, neg_big, sim)

                # argmax with first-index tie-break (torch .max(dim=-1))
                mx = jnp.max(sim, axis=-1, keepdims=True)          # (N, 1)
                first_idx = jnp.min(jnp.where(sim == mx, col, K_pad),
                                    axis=-1, keepdims=True)        # (N, 1)
                one_hot = (col == first_idx).astype(jnp.float32)   # (N, K_pad)

                counts = jnp.sum(one_hot, axis=0, keepdims=True)   # (1, K_pad)

                # p_new^T = x^T @ one_hot : plain NN matmul, kept in f32 so the
                # prototype values and the 1e-5 convergence test match eager
                # PyTorch (bf16 here would perturb prototypes ~1e-3 relative).
                p_newT = jnp.dot(xt_ref[...], one_hot,
                                 preferred_element_type=jnp.float32)  # (D, K_pad)
                # divide by cluster sizes after the matmul (PyTorch op order);
                # reciprocal on the EUP slot. Pad cols: p_newT is exactly 0.
                p_newT = p_newT * pl.reciprocal(counts + 1e-6, approx=True)

                diff = p_newT - pT                                 # pad cols stay 0
                var = jnp.sum(diff * diff) * inv_kd                # mean over K*D
                p_ref[...] = p_newT
                done_ref[0] = (var < tol).astype(jnp.int32)
            return carry

        lax.fori_loop(0, max_iter, body, jnp.int32(0))

    return kernel


@functools.lru_cache(maxsize=None)
def _get_kmeans_fn(N, D, K, K_pad, max_iter):
    kernel = _make_kmeans_kernel(N, D, K, K_pad, max_iter)
    call = pl.pallas_call(
        kernel,
        grid=(1,),
        in_specs=[pl.BlockSpec((N, D), lambda i: (0, 0)),        # x bf16
                  pl.BlockSpec((D, N), lambda i: (0, 0)),        # x^T f32
                  pl.BlockSpec((D, K_pad), lambda i: (0, 0))],   # p0^T f32
        out_specs=pl.BlockSpec((D, K_pad), lambda i: (0, 0)),
        out_shape=jax.ShapeDtypeStruct((D, K_pad), jnp.float32),
        scratch_shapes=[pltpu.SMEM((1,), jnp.int32)],            # converged flag
        compiler_params=pltpu.CompilerParams(
            dimension_semantics=("arbitrary",),
            vmem_limit_bytes=32 * 1024 * 1024),
    )
    return jax.jit(call)


# ---------------------------------------------------------------------------
# Pallas kernel: dense linear layer  y = x @ W + b  (CrossAttention projections)
# W is streamed in bf16 (DMA-bound layer); dot is bf16 x bf16 -> f32 accumulate.
# block_n=384 gives a 5-step grid for the qkv projection (even v7x core split).
# ---------------------------------------------------------------------------
def pallas_linear(x, w, b, block_n=384):
    M, Din = x.shape
    Dout = w.shape[1]
    if Dout % block_n != 0:
        block_n = Dout
    grid = (Dout // block_n,)

    def kernel(x_ref, w_ref, b_ref, o_ref):
        o_ref[...] = (jnp.dot(x_ref[...].astype(jnp.bfloat16), w_ref[...],
                              preferred_element_type=jnp.float32) + b_ref[...])

    return pl.pallas_call(
        kernel,
        grid=grid,
        in_specs=[pl.BlockSpec((M, Din), lambda j: (0, 0)),
                  pl.BlockSpec((Din, block_n), lambda j: (0, j)),
                  pl.BlockSpec((1, block_n), lambda j: (0, j))],
        out_specs=pl.BlockSpec((M, block_n), lambda j: (0, j)),
        out_shape=jax.ShapeDtypeStruct((M, Dout), jnp.float32),
        compiler_params=pltpu.CompilerParams(
            dimension_semantics=("parallel",)),
    )(x, w.astype(jnp.bfloat16), b)


# ---------------------------------------------------------------------------
# CrossAttention
# TODO(synk): the CrossAttention class is NOT defined in the provided source;
# implemented as standard multi-head attention (dim=640, heads=8,
# qkv_bias=True, extra `scale` multiplier on the logits), query from the input
# and key/value from memory_bank (None on first call -> self-attention).
# ---------------------------------------------------------------------------
def init_cross_attention_params(key, dim):
    k1, k2 = jax.random.split(key)
    return {
        # weights stored in bf16 once (streamed as bf16 by pallas_linear)
        "w_qkv": (0.02 * jax.random.normal(k1, (dim, 3 * dim), jnp.float32)
                  ).astype(jnp.bfloat16),
        "b_qkv": jnp.zeros((1, 3 * dim), jnp.float32),
        "w_proj": (0.02 * jax.random.normal(k2, (dim, dim), jnp.float32)
                   ).astype(jnp.bfloat16),
        "b_proj": jnp.zeros((1, dim), jnp.float32),
    }


def cross_attention(x, params, num_heads=8, scale=1.0, memory_bank=None):
    K, D = x.shape
    head_dim = D // num_heads
    kv_src = x if memory_bank is None else memory_bank

    qkv_q = pallas_linear(x, params["w_qkv"], params["b_qkv"])        # (K, 3D)
    qkv_kv = qkv_q if memory_bank is None else pallas_linear(
        kv_src, params["w_qkv"], params["b_qkv"])

    q = qkv_q[:, :D]
    k = qkv_kv[:, D:2 * D]
    v = qkv_kv[:, 2 * D:]

    def split_heads(t):
        return t.reshape(t.shape[0], num_heads, head_dim).transpose(1, 0, 2)

    qh, kh, vh = split_heads(q), split_heads(k), split_heads(v)        # (H, K, hd)
    logits = jnp.einsum("hqd,hkd->hqk", qh, kh) * (head_dim ** -0.5) * scale
    attn = jax.nn.softmax(logits, axis=-1)
    out = jnp.einsum("hqk,hkd->hqd", attn, vh)                         # (H, K, hd)
    out = out.transpose(1, 0, 2).reshape(K, D)
    return pallas_linear(out, params["w_proj"], params["b_proj"])


# ---------------------------------------------------------------------------
# get_lans (DynamicKmeansV2): singular values -> sigmoid-standardized weights
# ---------------------------------------------------------------------------
def get_lans(x):
    # TODO(synk): torch.linalg.svd has no Pallas equivalent; jnp.linalg.svd glue.
    s = jnp.linalg.svd(x, compute_uv=False)
    sv_means = s.mean()
    lan = jax.nn.sigmoid((s - s.mean()) / jnp.sqrt(jnp.var(s, ddof=1)))  # torch .var() is unbiased
    lan = lan / lan.max()
    return lan, sv_means


# ---------------------------------------------------------------------------
# DynamicKmeansV4.forward
# ---------------------------------------------------------------------------
def dynamic_kmeans_v4_forward(x, attn_params, *, max_iter=200,
                              basis_threshold=0.5, num_heads=8, scale=1.0):
    x = x.astype(jnp.float32)
    N, D = x.shape

    lan, sv_means = get_lans(x)
    # data-dependent cluster count, resolved eagerly (same as eager PyTorch)
    n_cluster = int(jnp.sum(lan > basis_threshold))
    assert n_cluster >= 1, "n_cluster must be >= 1 (pick a suitable basis_threshold)"
    K = n_cluster

    prototypes = x[:K]                                   # (K, D)
    prototypes = cross_attention(prototypes, attn_params, num_heads, scale)

    K_pad = max(((K + 127) // 128) * 128, 128)
    # prototypes kept transposed (D, K_pad) inside the kernel; pad cols zero.
    p0T = jnp.zeros((D, K_pad), jnp.float32).at[:, :K].set(prototypes.T)
    x_bf16 = x.astype(jnp.bfloat16)                      # one-time cast (sim matmul)
    xT = x.T                                             # one-time transpose (update matmul)

    # whole max_iter loop + early break fused into a single device kernel
    kmeans = _get_kmeans_fn(N, D, K, K_pad, max_iter)
    pT_final = kmeans(x_bf16, xT, p0T)

    prototypes = pT_final[:, :K].T                       # back to (K, D)
    # (self.crossattention.memory_bank = prototypes.detach() -- stateful side
    #  effect; caller can keep `prototypes` as the new memory bank.)
    return prototypes, sv_means


if __name__ == "__main__":
    key = jax.random.PRNGKey(0)
    k_x, k_attn = jax.random.split(key)

    N, D = 64, 640                                       # D=640 fixed by CrossAttention(640, 8, ...)
    x = jax.random.normal(k_x, (N, D), jnp.float32)
    attn_params = init_cross_attention_params(k_attn, D)

    # basis_threshold=0.5 (the module default of 100 would give 0 clusters
    # since lan is sigmoid-normalized into (0, 1]).
    prototypes, sv_means = dynamic_kmeans_v4_forward(
        x, attn_params, max_iter=200, basis_threshold=0.5, num_heads=8, scale=1.0)

    jax.block_until_ready((prototypes, sv_means))
    print("KERNEL_OK")
</pallas_src>

<mosaic_0001>
module attributes {stable_mosaic.version = 11 : i64} {
  func.func @kernel(%arg0: i32, %arg1: memref<37x640xf32, #tpu.memory_space<vmem>>, %arg2: memref<640x384xbf16, #tpu.memory_space<vmem>>, %arg3: memref<1x384xf32, #tpu.memory_space<vmem>>, %arg4: memref<37x384xf32, #tpu.memory_space<vmem>>) attributes {dimension_semantics = [#tpu.dimension_semantics<parallel>], iteration_bounds = array<i64: 5>, scalar_prefetch = 0 : i64, scratch_operands = 0 : i64, tpu.core_type = #tpu.core_type<tc>, window_params = [{pipeline_mode = #tpu.pipeline_mode<synchronous>, transform_indices = @transform_0, window_bounds = array<i64: 37, 640>}, {transform_indices = @transform_1, window_bounds = array<i64: 640, 384>}, {transform_indices = @transform_2, window_bounds = array<i64: 1, 384>}, {transform_indices = @transform_3, window_bounds = array<i64: 37, 384>}]} {
    %c0 = arith.constant 0 : index
    %c0_0 = arith.constant 0 : index
    %0 = vector.load %arg1[%c0, %c0_0] : memref<37x640xf32, #tpu.memory_space<vmem>>, vector<37x640xf32>
    %1 = arith.truncf %0 : vector<37x640xf32> to vector<37x640xbf16>
    %c0_1 = arith.constant 0 : index
    %c0_2 = arith.constant 0 : index
    %2 = vector.load %arg2[%c0_1, %c0_2] : memref<640x384xbf16, #tpu.memory_space<vmem>>, vector<640x384xbf16>
    %cst = arith.constant dense<0.000000e+00> : vector<37x384xf32>
    %3 = tpu.matmul %1, %2, %cst {dimension_numbers = #tpu.dot_dimension_numbers<[1], [0], [0], [1], [0, 0, 1, 1], [], []>} : vector<37x640xbf16>, vector<640x384xbf16>, vector<37x384xf32> -> vector<37x384xf32>
    %c0_3 = arith.constant 0 : index
    %c0_4 = arith.constant 0 : index
    %4 = vector.load %arg3[%c0_3, %c0_4] : memref<1x384xf32, #tpu.memory_space<vmem>>, vector<1x384xf32>
    %5 = vector.broadcast %4 : vector<1x384xf32> to vector<37x384xf32>
    %6 = arith.addf %3, %5 : vector<37x384xf32>
    %c0_5 = arith.constant 0 : index
    %c0_6 = arith.constant 0 : index
    %7 = vector.load %arg4[%c0_5, %c0_6] : memref<37x384xf32, #tpu.memory_space<vmem>>, vector<37x384xf32>
    tpu.vector_store %arg4[%c0_5, %c0_6], %6 {strides = array<i32>} : memref<37x384xf32, #tpu.memory_space<vmem>>, vector<37x384xf32>,
    return
  }
  func.func @transform_0(%arg0: i32) -> (i32, i32) {
    %c0_i32 = arith.constant 0 : i32
    %c0_i32_0 = arith.constant 0 : i32
    %c0_i32_1 = arith.constant 0 : i32
    return %c0_i32, %c0_i32_0 : i32, i32
  }
  func.func @transform_1(%arg0: i32) -> (i32, i32) {
    %c0_i32 = arith.constant 0 : i32
    %c0_i32_0 = arith.constant 0 : i32
    return %c0_i32, %arg0 : i32, i32
  }
  func.func @transform_2(%arg0: i32) -> (i32, i32) {
    %c0_i32 = arith.constant 0 : i32
    %c0_i32_0 = arith.constant 0 : i32
    return %c0_i32, %arg0 : i32, i32
  }
  func.func @transform_3(%arg0: i32) -> (i32, i32) {
    %c0_i32 = arith.constant 0 : i32
    %c0_i32_0 = arith.constant 0 : i32
    return %c0_i32, %arg0 : i32, i32
  }
}

</mosaic_0001>

<bundles_post_ra>
// kernel: tpu_custom_call.1
= control target key start
LH: loop header
LB: loop body
LE: loop exit
PB: predicated region body
PF: predicated region fallthrough
CT: control target
= control target key end

     0   :  { %s2687_s0 = inlined_call_operand.hbm [shape: f32[37,640], index: 0, kind: input, shape index: {}]   ;;  %s2688_s1 = inlined_call_operand.hbm [shape: bf16[640,1920], index: 1, kind: input, shape index: {}]   ;;  %s2689_s2 = inlined_call_operand.hbm [shape: f32[1,1920], index: 2, kind: input, shape index: {}]   ;;  %s2690_s3 = inlined_call_operand.hbm [shape: f32[37,1920], index: 3, kind: output, shape index: {}]  }
   0x1   :  { %2696 = sst [smem:[#allocation13_spill]] %s2688_s1 }
   0x2   :  { %8 = vsyncpa [#allocation3], 0 }
   0x3   :  { %9 = vsyncpa [#allocation6], 0 }
   0x4   :  { %11 = vsyncpa [#allocation6 + $0x1], 0 }
   0x5   :  { %12 = vsyncpa [#allocation4], 0 }
   0x6   :  { %14 = vsyncpa [#allocation4 + $0x1], 0  ;;  %s2251_s12 = smov 0   ;;  %s2253_s13 = smov 0  }
   0x7   :  { %s2255_s14 = smov 0   ;;  %s2257_s15 = smov 0  }
   0x8 LB: > { %s2272_s16 = sadd.s32 1, %s2214_s15   ;;  %s48_s17 = sadd.s32 1, %s2210_s14  ;;  %s2214_s15 = sphi %s2257_s15, %s2717_s15   ;;  %s2210_s14 = sphi %s2255_s14, %s2716_s14   ;;  %s2206_s13 = sphi %s2253_s13, %s2715_s13   ;;  %s2202_s12 = sphi %s2251_s12, %s2714_s12  }
   0x9   : > { %s45_s18 = ssub.s32 %s2214_s15, %s2272_s16  ;;  %p55_p0 = scmp.ne.s32.totalorder %s2210_s14, %s2206_s13 }
   0xa   : > { %p46_p1 = scmp.eq.s32.totalorder %s45_s18, 0  ;;  %p56_p2 = scmp.eq.s32.totalorder %s2214_s15, 0 }
   0xb   : > { %p1857_p3 = scmp.lt.s32.totalorder %s2214_s15, 5  ;;  %s150_s20 = sand.u32 1, %s2214_s15  }
   0xc   : > { %s2282_s19 = scalar_select %p46_p1, %s2210_s14, %s48_s17  }
   0xd   : > { %p57_p4 = por %p56_p2, %p55_p0  ;;  %s152_s21 = sand.u32 1, %s2210_s14  }
   0xe   : > { %2697 = sst [smem:[#allocation12_spill]] %s2282_s19  ;;  %s1826_s22 = smul.u32 960, %s152_s21 }
   0xf   : > { %p2291_p5 = pnand %p1857_p3, %p57_p4  ;;  %s1716_s24 = smul.u32 192, %s2214_s15 }
  0x10   : > { %s2699_s1 = sld [smem:[#allocation13_spill]]  ;;  %s154_s28 = scalar_lea.vmem [#allocation5], %s1826_s22 }
  0x11   : > { %s161_s29 = sshll.u32 %s154_s28, 4  ;;  %s2303_s30 = scalar_lea.sflag [#allocation6], %s150_s20  ;;  %s2301_s29 = int_to_ptr.vmem [resolvable:$true] %s161_s29 }
  0x12   : > { %p2691_p7 = pneg %p2291_p5 }
  0x16   : > { %s2299_s27 = scalar_lea.hbm %s2699_s1, %s1716_s24  ;;  %s2069_s7 = scalar_lea.hbm %s2699_s1, 76800 }
  0x17   : > { %s2064_s4 = scalar_lea.hbm %s2299_s27, 15360  ;;  %p2070_p10 = scmp.lt.s32.totalorder %s2299_s27, %s2699_s1 }
  0x18   : > { %p2065_p6 = scmp.ne.s32.totalorder %s2299_s27, %s2064_s4  ;;  %p2071_p11 = scmp.lt.s32.totalorder %s2069_s7, %s2064_s4 }
  0x1a   : > { %p2067_p8 = pnand %p2691_p7, %p2065_p6  ;;  %p2072_p12 = por %p2071_p11, %p2070_p10 }
  0x1c   : > { %p2068_p9 = pneg %p2067_p8 }
  0x1e   : > { %p2073_p13 = pnand %p2072_p12, %p2068_p9 }
  0x20   : > { %2076 = shalt.err (!%p2073_p13)
}
  0x21   : > { %s2077_s10 = scalar_lea.vmem %s2301_s29, 15360  ;;  %s2216_s11 = smov [#allocation5]  }
  0x22   : > { %p2078_p1 = scmp.ne.s32.totalorder %s2301_s29, %s2077_s10  ;;  %s2082_s17 = sshll.u32 %s2216_s11, 4  ;;  %s2083_s17 = int_to_ptr.vmem [resolvable:$false] %s2082_s17 }
  0x23   : > { %s2084_s18 = scalar_lea.vmem %s2083_s17, 30720  ;;  %p2085_p4 = scmp.lt.s32.totalorder %s2301_s29, %s2083_s17 }
  0x24   : > { %p2080_p2 = pnand %p2078_p1, %p2691_p7  ;;  %p2086_p6 = scmp.lt.s32.totalorder %s2084_s18, %s2077_s10 }
  0x26   : > { %p2081_p3 = pneg %p2080_p2  ;;  %p2087_p8 = por %p2086_p6, %p2085_p4 }
  0x28   : > { %p2088_p10 = pnand %p2087_p8, %p2081_p3 }
  0x2a   : > { %2091 = shalt.err (!%p2088_p10)
}
  0x2b   : > { %s2217_s20 = smov 960   ;;  %s2218_s22 = smov 192  }
  0x2c   : > { %s2219_s24 = smov 12   ;;  %s2331_s25 = sadd.s32 4294967295, %s2214_s15  }
  0x2d   : > { %1848 = dma.hbm_to_vmem [thread:$0]  (!%p2291_p5), %s2299_s27, 15360, %s2301_s29, %s2303_s30, %s2217_s20, %s2218_s22, %s2219_s24  }
  0x2e   : > { %s1585_s26 = sadd.s32 4294967294, %s2214_s15   ;;  %p61_p9 = scmp.ne.s32.totalorder %s2206_s13, %s2202_s12 }
  0x2f   : > { %p2692_p11 = scmp.eq.s32.totalorder %s2331_s25, 0  ;;  %p111_p12 = scmp.eq.s32.totalorder %s2331_s25, 4 }
  0x30   : > { %p117_p13 = scmp.eq.s32.totalorder %s1585_s26, 4  ;;  %p1586_p1 = scmp.ge.s32.totalorder %s2214_s15, 1 }
  0x31   : > { %p2341_p2 = por %p2692_p11, %p61_p9  ;;  %p2348_p3 = por %p111_p12, %p55_p0 }
  0x32   : > { %p2352_p4 = por %p117_p13, %p61_p9  ;;  %p124_p6 = scmp.lt.s32.totalorder %s2214_s15, 6 }
  0x33   : > { %s2700_s28 = scalar_select %p2341_p2, 1, 0 }
  0x34   : > { %s2701_s27 = scalar_select %p2348_p3, 1, 0 }
  0x35   : > { %s2702_s29 = scalar_select %p2352_p4, 1, 0 }
  0x36   : > { %p2357_p8 = pnand %p1586_p1, %p124_p6  ;;  %s2220_s5 = smov [#allocation2]  }
  0x37   : > { %s136_s6 = sshll.u32 %s2220_s5, 4  ;;  %s1827_s7 = smul.u32 3, %s152_s21  ;;  %s137_s6 = int_to_ptr.vmem [resolvable:$true] %s136_s6 }
  0x38   : > { %s2703_s4 = scalar_select %p2357_p8, 1, 0 }
  0x39   : > { %p1841_p10 = pneg %p2357_p8  ;;  %s1717_s9 = smul.u32 48, %s2214_s15 }
  0x3a   : > { %s2103_s18 = scalar_lea.vmem %s137_s6, 3200  ;;  %p2111_p6 = scmp.lt.s32.totalorder %s137_s6, %s137_s6 }
  0x3b   : > { %p2367_p0 = pnand %p1841_p10, %p2692_p11  ;;  %s2375_s17 = scalar_lea.hbm %s2689_s2, %s1717_s9 }
  0x3c   : > { %p2104_p12 = scmp.ne.s32.totalorder %s137_s6, %s2103_s18  ;;  %p2112_p7 = scmp.lt.s32.totalorder %s2103_s18, %s2103_s18 }
  0x3d   : > { %p2094_p9 = pneg %p2367_p0 }
  0x3e   : > { %p2113_p4 = por %p2112_p7, %p2111_p6 }
  0x3f   : > { %p2106_p13 = pnand %p2104_p12, %p2094_p9 }
  0x41   : > { %p2107_p1 = pneg %p2106_p13 }
  0x43   : > { %p2114_p10 = pnand %p2113_p4, %p2107_p1 }
  0x45   : > { %2117 = shalt.err (!%p2114_p10)
}
  0x46   : > { %s2221_s21 = smov 640   ;;  %s2222_s20 = smov 40  }
  0x47   : > { %1844 = dma.hbm_to_vmem [thread:$0]  (!%p2367_p0), %s2687_s0, 3200, %s137_s6, [#allocation3], %s2221_s21, %s2221_s21, %s2222_s20  }
  0x48   : > { %s175_s26 = scalar_lea.vmem [#allocation7], %s1827_s7  ;;  %s2118_s9 = scalar_lea.hbm %s2375_s17, 48 }
  0x49   : > { %s183_s5 = sshll.u32 %s175_s26, 4  ;;  %p2119_p9 = scmp.ne.s32.totalorder %s2375_s17, %s2118_s9  ;;  %s184_s5 = int_to_ptr.vmem [resolvable:$true] %s183_s5 }
  0x4a   : > { %p2705_p7 = pneg %p2291_p5  ;;  %s2123_s18 = scalar_lea.hbm %s2689_s2, 240 }
  0x4b   : > { %p2124_p13 = scmp.lt.s32.totalorder %s2375_s17, %s2689_s2  ;;  %p2125_p1 = scmp.lt.s32.totalorder %s2123_s18, %s2118_s9 }
  0x4c   : > { %p2121_p4 = pnand %p2119_p9, %p2705_p7 }
  0x4d   : > { %p2126_p6 = por %p2125_p1, %p2124_p13 }
  0x4e   : > { %p2122_p12 = pneg %p2121_p4 }
  0x50   : > { %p2127_p0 = pnand %p2126_p6, %p2122_p12 }
  0x52   : > { %2130 = shalt.err (!%p2127_p0)
}
  0x53   : > { %s2131_s6 = scalar_lea.vmem %s184_s5, 48  ;;  %p2706_p11 = pmov %p2705_p7 }
  0x54   : > { %p2132_p10 = scmp.ne.s32.totalorder %s184_s5, %s2131_s6  ;;  %s2223_s7 = smov [#allocation7]  }
  0x55   : > { %s2136_s8 = sshll.u32 %s2223_s7, 4  ;;  %s2137_s8 = int_to_ptr.vmem [resolvable:$false] %s2136_s8 }
  0x56   : > { %p2134_p3 = pnand %p2132_p10, %p2706_p11  ;;  %s2138_s21 = scalar_lea.vmem %s2137_s8, 96 }
  0x57   : > { %p2139_p7 = scmp.lt.s32.totalorder %s184_s5, %s2137_s8  ;;  %p2140_p4 = scmp.lt.s32.totalorder %s2138_s21, %s2131_s6 }
  0x58   : > { %p2135_p9 = pneg %p2134_p3 }
  0x59   : > { %p2141_p2 = por %p2140_p4, %p2139_p7 }
  0x5b   : > { %p2142_p8 = pnand %p2141_p2, %p2135_p9 }
  0x5d   : > { %2145 = shalt.err (!%p2142_p8)
}
  0x5e   : > { %1851 = dma.hbm_to_vmem [thread:$0]  (!%p2291_p5), %s2375_s17, 48, %s184_s5, %s2303_s30  }
  0x5f   : > { %p2707_p12 = scmp.ne.s32.totalorder %s2703_s4, 0 }
  0x60   : > { %p2708_p11 = scmp.eq.s32.totalorder (!%p2707_p12), %s2331_s25, 0 }
  0x61   : > { %192 = sbr.rel (%p2707_p12) target bundleno = 469 (0x1d5), region = 32 }
  0x66   : > { %2189 = dma.done.wait (%p2708_p11), [#allocation3], 3200   ;;  %p2709_p3 = pmov %p2708_p11 }
  0x67   : > { %s198_s1 = sand.u32 1, %s2331_s25   ;;  %s2411_s19 = sand.u32 1, %s2206_s13  }
  0x68   : > { %2191 = vsyncadd (%p2709_p3), [#allocation3], 4294964096  ;;  %s1828_s23 = smul.u32 960, %s2411_s19  ;;  %s199_s20 = scalar_lea.sflag [#allocation6], %s198_s1 }
  0x69   : > { %p2710_p5 = scmp.ne.s32.totalorder %s2700_s28, 0 }
  0x6a   : > { %s2414_s22 = scalar_lea.vmem [#allocation5], %s1828_s23 }
  0x6b   : > { %2193 = dma.done.wait (%p2710_p5), %s199_s20, 15408  }
  0x6c   : > { %2195 = vsyncadd (%p2710_p5), %s199_s20, 4294951888  ;;  %v1904_v0 = vld [vmem:[%s2414_s22 + $0xac] ss:$12 sps:$4 sm:$0xff]   ;;  %v1908_v2 = vld [vmem:[%s2414_s22 + $0xa8] ss:$12 sps:$4 sm:$0xff]   ;;  %vm2226_vm0 = vmmov 0  }
  0x6d   : > { %v1906_v1 = vld [vmem:[%s2414_s22 + $0x22c] ss:$12 sps:$4 sm:$0xff]   ;;  %1100 = vmatprep.subr.bf16.mxu0 %v1904_v0  ;;  %v1909_v3 = vld [vmem:[%s2414_s22 + $0x228] ss:$12 sps:$4 sm:$0xff]   ;;  %v1914_v6 = vld [vmem:[%s2414_s22 + $0x90] ss:$12 sps:$4 sm:$0xff]  }
  0x6e   : > { %1161 = vmatprep.subr.bf16.mxu1 %v1906_v1  ;;  %v1910_v4 = vld [vmem:[%s2414_s22 + $0x94] ss:$12 sps:$4 sm:$0xff]   ;;  %1101 = vmatpush1.bf16.msra.mxu0 %v1908_v2  ;;  %v1915_v7 = vld [vmem:[%s2414_s22 + $0x210] ss:$12 sps:$4 sm:$0xff]   ;;  %v1920_v10 = vld [vmem:[%s2414_s22 + $0x78] ss:$12 sps:$4 sm:$0xff]  }
  0x6f   : > { %1162 = vmatpush1.bf16.msra.mxu1 %v1909_v3  ;;  %v1912_v5 = vld [vmem:[%s2414_s22 + $0x214] ss:$12 sps:$4 sm:$0xff]   ;;  %1102 = vmatprep.subr.bf16.mxu0 %v1910_v4  ;;  %v1916_v8 = vld [vmem:[%s2414_s22 + $0x7c] ss:$12 sps:$4 sm:$0xff]   ;;  %v1921_v11 = vld [vmem:[%s2414_s22 + $0x1f8] ss:$12 sps:$4 sm:$0xff]  }
  0x70   : > { %1163 = vmatprep.subr.bf16.mxu1 %v1912_v5  ;;  %v1918_v9 = vld [vmem:[%s2414_s22 + $0x1fc] ss:$12 sps:$4 sm:$0xff]   ;;  %v1922_v12 = vld [vmem:[%s2414_s22 + $0x64] ss:$12 sps:$4 sm:$0xff]   ;;  %v1926_v14 = vld [vmem:[%s2414_s22 + $0x60] ss:$12 sps:$4 sm:$0xff]  }
  0x71   : > { %v1924_v13 = vld [vmem:[%s2414_s22 + $0x1e4] ss:$12 sps:$4 sm:$0xff]   ;;  %v1927_v15 = vld [vmem:[%s2414_s22 + $0x1e0] ss:$12 sps:$4 sm:$0xff]   ;;  %v1932_v18 = vld [vmem:[%s2414_s22 + $0x48] ss:$12 sps:$4 sm:$0xff]  }
  0x72   : > { %1103 = vmatpush1.bf16.msra.mxu0 %v1914_v6  ;;  %v1928_v16 = vld [vmem:[%s2414_s22 + $0x4c] ss:$12 sps:$4 sm:$0xff]   ;;  %v1933_v19 = vld [vmem:[%s2414_s22 + $0x1c8] ss:$12 sps:$4 sm:$0xff]   ;;  %v1938_v22 = vld [vmem:[%s2414_s22 + $0x30] ss:$12 sps:$4 sm:$0xff]  }
  0x73   : > { %1164 = vmatpush1.bf16.msra.mxu1 %v1915_v7  ;;  %1104 = vmatprep.subr.bf16.mxu0 %v1916_v8  ;;  %v1930_v17 = vld [vmem:[%s2414_s22 + $0x1cc] ss:$12 sps:$4 sm:$0xff]   ;;  %v1934_v20 = vld [vmem:[%s2414_s22 + $0x34] ss:$12 sps:$4 sm:$0xff]   ;;  %v1939_v23 = vld [vmem:[%s2414_s22 + $0x1b0] ss:$12 sps:$4 sm:$0xff]  }
  0x74   : > { %1165 = vmatprep.subr.bf16.mxu1 %v1918_v9  ;;  %v1936_v21 = vld [vmem:[%s2414_s22 + $0x1b4] ss:$12 sps:$4 sm:$0xff]   ;;  %v1940_v24 = vld [vmem:[%s2414_s22 + $0x1c] ss:$12 sps:$4 sm:$0xff]   ;;  %v1944_v26 = vld [vmem:[%s2414_s22 + $0x18] ss:$12 sps:$4 sm:$0xff]  }
  0x75   : > { %v1942_v25 = vld [vmem:[%s2414_s22 + $0x19c] ss:$12 sps:$4 sm:$0xff]   ;;  %v1945_v27 = vld [vmem:[%s2414_s22 + $0x198] ss:$12 sps:$4 sm:$0xff]   ;;  %v1950_v30 = vld [vmem:[%s2414_s22] ss:$12 sps:$4 sm:$0xff]  }
  0x76   : > { %1105 = vmatpush1.bf16.msra.mxu0 %v1920_v10  ;;  %v1946_v28 = vld [vmem:[%s2414_s22 + $0x4] ss:$12 sps:$4 sm:$0xff]   ;;  %v1951_v31 = vld [vmem:[%s2414_s22 + $0x180] ss:$12 sps:$4 sm:$0xff]   ;;  %v1956_v34 = vld [vmem:[%s2414_s22 + $0x168] ss:$12 sps:$4 sm:$0xff]  }
  0x77   : > { %1166 = vmatpush1.bf16.msra.mxu1 %v1921_v11  ;;  %1106 = vmatprep.subr.bf16.mxu0 %v1922_v12  ;;  %v1948_v29 = vld [vmem:[%s2414_s22 + $0x184] ss:$12 sps:$4 sm:$0xff]   ;;  %v1952_v32 = vld [vmem:[%s2414_s22 + $0x16c] ss:$12 sps:$4 sm:$0xff]   ;;  %v1957_v35 = vld [vmem:[%s2414_s22 + $0x2e8] ss:$12 sps:$4 sm:$0xff]  }
  0x78   : > { %1167 = vmatprep.subr.bf16.mxu1 %v1924_v13  ;;  %v1954_v33 = vld [vmem:[%s2414_s22 + $0x2ec] ss:$12 sps:$4 sm:$0xff]   ;;  %v1958_v36 = vld [vmem:[%s2414_s22 + $0x154] ss:$12 sps:$4 sm:$0xff]   ;;  %v1962_v38 = vld [vmem:[%s2414_s22 + $0x150] ss:$12 sps:$4 sm:$0xff]  }
  0x79   : > { %v1960_v37 = vld [vmem:[%s2414_s22 + $0x2d4] ss:$12 sps:$4 sm:$0xff]   ;;  %v1963_v39 = vld [vmem:[%s2414_s22 + $0x2d0] ss:$12 sps:$4 sm:$0xff]   ;;  %v1968_v42 = vld [vmem:[%s2414_s22 + $0x138] ss:$12 sps:$4 sm:$0xff]  }
  0x7a   : > { %1107 = vmatpush1.bf16.msra.mxu0 %v1926_v14  ;;  %v1964_v40 = vld [vmem:[%s2414_s22 + $0x13c] ss:$12 sps:$4 sm:$0xff]   ;;  %v1969_v43 = vld [vmem:[%s2414_s22 + $0x2b8] ss:$12 sps:$4 sm:$0xff]   ;;  %v246_v48 = vld [vmem:[#allocation2 + $0x18] sm:$0xff]  ;;  %s1829_s30 = smul.u32 3, %s2411_s19 }
  0x7b   : > { %1168 = vmatpush1.bf16.msra.mxu1 %v1927_v15  ;;  %1108 = vmatprep.subr.bf16.mxu0 %v1928_v16  ;;  %v1966_v41 = vld [vmem:[%s2414_s22 + $0x2bc] ss:$12 sps:$4 sm:$0xff]   ;;  %v1970_v44 = vld [vmem:[%s2414_s22 + $0x124] ss:$12 sps:$4 sm:$0xff]   ;;  %v1974_v50 = vld [vmem:[%s2414_s22 + $0x120] ss:$12 sps:$4 sm:$0xff]  }
  0x7c   : > { %1169 = vmatprep.subr.bf16.mxu1 %v1930_v17  ;;  %v1972_v45 = vld [vmem:[%s2414_s22 + $0x2a4] ss:$12 sps:$4 sm:$0xff]   ;;  %v249_v47 = vld [vmem:[#allocation2 + $0x30] sm:$0xff]  ;;  %v251_v49 = vld [vmem:[#allocation2 + $0x40] sm:$0xff]  ;;  %s211_s28 = scalar_lea.vmem [#allocation7], %s1829_s30  ;;  %s1830_s4 = smul.u32 120, %s2411_s19 }
  0x7d   : > { %v244_v46 = vld [vmem:[#allocation2 + $0x8] sm:$0xff]  ;;  %v1976_v52 = vld [vmem:[%s2414_s22 + $0x10c] ss:$12 sps:$4 sm:$0xff]   ;;  %v2471_v54 = vpack.c.bf16 %v251_v49, %v246_v48  ;;  %v1980_v56 = vld [vmem:[%s2414_s22 + $0x108] ss:$12 sps:$4 sm:$0xff]   ;;  %s1718_s24 = smul.u32 384, %s2331_s25 }
  0x7e   : > { %1109 = vmatpush1.bf16.msra.mxu0 %v1932_v18  ;;  %v1975_v51 = vld [vmem:[%s2414_s22 + $0x2a0] ss:$12 sps:$4 sm:$0xff]   ;;  %v2469_v53 = vpack.c.bf16 %v249_v47, %v244_v46  ;;  %v1981_v57 = vld [vmem:[%s2414_s22 + $0x288] ss:$12 sps:$4 sm:$0xff]   ;;  %v1986_v60 = vld [vmem:[%s2414_s22 + $0xf0] ss:$12 sps:$4 sm:$0xff]  }
  0x7f   : > { %1170 = vmatpush1.bf16.msra.mxu1 %v1933_v19  ;;  %1110 = vmatprep.subr.bf16.mxu0 %v1934_v20  ;;  %v1978_v55 = vld [vmem:[%s2414_s22 + $0x28c] ss:$12 sps:$4 sm:$0xff]   ;;  %v1982_v58 = vld [vmem:[%s2414_s22 + $0xf4] ss:$12 sps:$4 sm:$0xff]   ;;  %v1987_v61 = vld [vmem:[%s2414_s22 + $0x270] ss:$12 sps:$4 sm:$0xff]   ;;  %s2642_s10 = scalar_lea.hbm %s2690_s3, %s1718_s24 }
  0x80   : > { %1171 = vmatprep.subr.bf16.mxu1 %v1936_v21  ;;  %1132 = vmatprep.mubr.bf16.mxu0 %v2469_v53  ;;  %v1984_v59 = vld [vmem:[%s2414_s22 + $0x274] ss:$12 sps:$4 sm:$0xff]   ;;  %v1988_v62 = vld [vmem:[%s2414_s22 + $0xdc] ss:$12 sps:$4 sm:$0xff]   ;;  %v1992_v0 = vld [vmem:[%s2414_s22 + $0xd8] ss:$12 sps:$4 sm:$0xff]  }
  0x81   : > { %1193 = vmatprep.mubr.bf16.mxu1 %v2471_v54  ;;  %v1990_v63 = vld [vmem:[%s2414_s22 + $0x25c] ss:$12 sps:$4 sm:$0xff]   ;;  %v1993_v1 = vld [vmem:[%s2414_s22 + $0x258] ss:$12 sps:$4 sm:$0xff]   ;;  %v1998_v4 = vld [vmem:[%s2414_s22 + $0xc0] ss:$12 sps:$4 sm:$0xff]  }
  0x82   : > { %1111 = vmatpush1.bf16.msra.mxu0 %v1938_v22  ;;  %v1994_v2 = vld [vmem:[%s2414_s22 + $0xc4] ss:$12 sps:$4 sm:$0xff]   ;;  %v1999_v5 = vld [vmem:[%s2414_s22 + $0x240] ss:$12 sps:$4 sm:$0xff]   ;;  %v243_v6 = vld [vmem:[#allocation2] sm:$0xff]  ;;  %s2618_s17 = scalar_lea.vmem [#allocation8], %s1830_s4 }
  0x83   : > { %1172 = vmatpush1.bf16.msra.mxu1 %v1939_v23  ;;  %1112 = vmatprep.subr.bf16.mxu0 %v1940_v24  ;;  %v1996_v3 = vld [vmem:[%s2414_s22 + $0x244] ss:$12 sps:$4 sm:$0xff]   ;;  %v245_v8 = vld [vmem:[#allocation2 + $0x10] sm:$0xff]  ;;  %v259_v14 = vld [vmem:[#allocation2 + $0x80] sm:$0xff]  ;;  %s1480_s26 = sshll.u32 %s2618_s17, 4  ;;  %s1467_s25 = scalar_lea.sflag [#allocation4], %s2411_s19  ;;  %s2644_s26 = int_to_ptr.vmem [resolvable:$true] %s1480_s26 }
  0x84   : > { %1173 = vmatprep.subr.bf16.mxu1 %v1942_v25  ;;  %v248_v7 = vld [vmem:[#allocation2 + $0x28] sm:$0xff]  ;;  %v250_v9 = vld [vmem:[#allocation2 + $0x38] sm:$0xff]  ;;  %v2002_v10 = vld [vmem:[%s2414_s22 + $0x3ac] ss:$12 sps:$4 sm:$0xff]   ;;  %s2146_s11 = scalar_lea.vmem %s2644_s26, 1920  ;;  %p2711_p8 = scmp.ne.s32.totalorder %s2701_s27, 0 }
  0x85   : > { %v2003_v11 = vld [vmem:[%s2414_s22 + $0x170] ss:$12 sps:$4 sm:$0xff]   ;;  %v2000_v13 = vld [vmem:[%s2414_s22 + $0x3a8] ss:$12 sps:$4 sm:$0xff]   ;;  %v256_v15 = vld [vmem:[#allocation2 + $0x68] sm:$0xff]  ;;  %v2493_v16 = vpack.c.bf16 %v248_v7, %v243_v6  ;;  %v2495_v17 = vpack.c.bf16 %v250_v9, %v245_v8  ;;  %v2225_v8 = vmov 0.0   ;;  %p2147_p2 = scmp.ne.s32.totalorder %s2644_s26, %s2146_s11 }
  0x86   : > { %1113 = vmatpush1.bf16.msra.mxu0 %v1944_v26  ;;  %v254_v12 = vld [vmem:[#allocation2 + $0x58] sm:$0xff]  ;;  %v261_v18 = vld [vmem:[#allocation2 + $0x90] sm:$0xff]  ;;  %v2008_v21 = vld [vmem:[%s2414_s22 + $0x158] ss:$12 sps:$4 sm:$0xff]   ;;  %s2227_s18 = smov [#allocation8]  }
  0x87   : > { %1174 = vmatpush1.bf16.msra.mxu1 %v1945_v27  ;;  %1114 = vmatprep.subr.bf16.mxu0 %v1946_v28  ;;  %v2004_v19 = vld [vmem:[%s2414_s22 + $0xb0] ss:$12 sps:$4 sm:$0xff]   ;;  %v2007_v20 = vld [vmem:[%s2414_s22 + $0x394] ss:$12 sps:$4 sm:$0xff]   ;;  %v2009_v23 = vld [vmem:[%s2414_s22 + $0x98] ss:$12 sps:$4 sm:$0xff]   ;;  %v2502_v24 = vpack.c.bf16 %v259_v14, %v254_v12  ;;  %v2504_v26 = vpack.c.bf16 %v261_v18, %v256_v15  ;;  %p2148_p13 = pnand %p2147_p2, %p2711_p8 }
  0x88   : > { %1175 = vmatprep.subr.bf16.mxu1 %v1948_v29  ;;  %v2005_v22 = vld [vmem:[%s2414_s22 + $0x390] ss:$12 sps:$4 sm:$0xff]   ;;  %v253_v25 = vld [vmem:[#allocation2 + $0x50] sm:$0xff]  ;;  %v2043_v9 = vld [vmem:[%s2414_s22 + $0x2d8] ss:$12 sps:$4 sm:$0xff]   ;;  %s2150_s6 = sshll.u32 %s2227_s18, 4  ;;  %s2151_s6 = int_to_ptr.vmem [resolvable:$false] %s2150_s6 }
  0x89   : > { %v2012_v27 = vld [vmem:[%s2414_s22 + $0x37c] ss:$12 sps:$4 sm:$0xff]   ;;  %v258_v28 = vld [vmem:[#allocation2 + $0x78] sm:$0xff]  ;;  %v2046_v14 = vld [vmem:[%s2414_s22 + $0x2c0] ss:$12 sps:$4 sm:$0xff]   ;;  %p2149_p1 = pneg %p2148_p13  ;;  %s2152_s7 = scalar_lea.vmem %s2151_s6, 3840 }
  0x8a   : > { %1115 = vmatpush1.bf16.msra.mxu0 %v1950_v30  ;;  %v255_v29 = vld [vmem:[#allocation2 + $0x60] sm:$0xff]  ;;  %v260_v30 = vld [vmem:[#allocation2 + $0x88] sm:$0xff]  ;;  %v265_v46 = vld [vmem:[#allocation2 + $0xb0] sm:$0x1f]  ;;  %p2153_p6 = scmp.lt.s32.totalorder %s2644_s26, %s2151_s6  ;;  %p2154_p0 = scmp.lt.s32.totalorder %s2152_s7, %s2146_s11 }
  0x8b   : > { %1176 = vmatpush1.bf16.msra.mxu1 %v1951_v31  ;;  %1116 = vmatprep.subr.bf16.mxu0 %v1952_v32  ;;  %v2013_v31 = vld [vmem:[%s2414_s22 + $0x140] ss:$12 sps:$4 sm:$0xff]   ;;  %v2010_v32 = vld [vmem:[%s2414_s22 + $0x378] ss:$12 sps:$4 sm:$0xff]   ;;  %v2023_v47 = vld [vmem:[%s2414_s22 + $0x110] ss:$12 sps:$4 sm:$0xff]  }
  0x8c   : > { %1177 = vmatprep.subr.bf16.mxu1 %v1954_v33  ;;  %v264_v33 = vld [vmem:[#allocation2 + $0xa8] sm:$0x1f]  ;;  %v2020_v48 = vld [vmem:[%s2414_s22 + $0x348] ss:$12 sps:$4 sm:$0xff]   ;;  %v2024_v49 = vld [vmem:[%s2414_s22 + $0x50] ss:$12 sps:$4 sm:$0xff]   ;;  %p2155_p10 = por %p2154_p0, %p2153_p6 }
  0x8d   : > { %v2041_v6 = vld [vmem:[%s2414_s22 + $0x230] ss:$12 sps:$4 sm:$0xff]   ;;  %v257_v12 = vld [vmem:[#allocation2 + $0x70] sm:$0xff] }
  0x8e   : > { %1117 = vmatpush2.bf16.msra.mxu0 %v1956_v34  ;;  %v2513_v34 = vpack.c.bf16 %v258_v28, %v253_v25  ;;  %v2042_v7 = vld [vmem:[%s2414_s22 + $0x3b0] ss:$12 sps:$4 sm:$0xff]   ;;  %v2047_v18 = vld [vmem:[%s2414_s22 + $0x200] ss:$12 sps:$4 sm:$0xff]   ;;  %v2055_v28 = vld [vmem:[%s2414_s22 + $0x278] ss:$12 sps:$4 sm:$0xff]   ;;  %p2156_p9 = pnand %p2155_p10, %p2149_p1 }
  0x8f   : > { %1178 = vmatpush2.bf16.msra.mxu1 %v1957_v35  ;;  %1118 = vmatprep.subr.bf16.mxu0 %v1958_v36  ;;  %v2515_v35 = vpack.c.bf16 %v260_v30, %v255_v29  ;;  %v266_v36 = vld [vmem:[#allocation2 + $0xb8] sm:$0x1f]  ;;  %v2056_v29 = vld [vmem:[%s2414_s22 + $0x1b8] ss:$12 sps:$4 sm:$0xff]  }
  0x90   : > { %1179 = vmatprep.subr.bf16.mxu1 %v1960_v37  ;;  %v2014_v37 = vld [vmem:[%s2414_s22 + $0x80] ss:$12 sps:$4 sm:$0xff]   ;;  %v2053_v25 = vld [vmem:[%s2414_s22 + $0x1d0] ss:$12 sps:$4 sm:$0xff]   ;;  %v2057_v30 = vld [vmem:[%s2414_s22 + $0x338] ss:$12 sps:$4 sm:$0xff]  }
  0x92   : > { %1119 = vmatpush2.bf16.msra.mxu0 %v1962_v38  ;;  %v2017_v38 = vld [vmem:[%s2414_s22 + $0x364] ss:$12 sps:$4 sm:$0xff]  }
  0x93   : > { %1180 = vmatpush2.bf16.msra.mxu1 %v1963_v39  ;;  %1120 = vmatprep.subr.bf16.mxu0 %v1964_v40  ;;  %v2018_v39 = vld [vmem:[%s2414_s22 + $0x128] ss:$12 sps:$4 sm:$0xff]   ;;  %v2015_v40 = vld [vmem:[%s2414_s22 + $0x360] ss:$12 sps:$4 sm:$0xff]  }
  0x94   : > { %1181 = vmatprep.subr.bf16.mxu1 %v1966_v41  ;;  %v2019_v41 = vld [vmem:[%s2414_s22 + $0x68] ss:$12 sps:$4 sm:$0xff]  }
  0x96   : > { %1121 = vmatpush2.bf16.msra.mxu0 %v1968_v42  ;;  %v2522_v42 = vpack.c.bf16 %v264_v33, %v264_v33  ;;  %v2060_v33 = vld [vmem:[%s2414_s22 + $0x320] ss:$12 sps:$4 sm:$0xff]  }
  0x97   : > { %1182 = vmatpush2.bf16.msra.mxu1 %v1969_v43  ;;  %1122 = vmatprep.subr.bf16.mxu0 %v1970_v44  ;;  %v2524_v43 = vpack.c.bf16 %v266_v36, %v266_v36  ;;  %v2022_v44 = vld [vmem:[%s2414_s22 + $0x34c] ss:$12 sps:$4 sm:$0xff]   ;;  %v2062_v36 = vld [vmem:[%s2414_s22 + $0x188] ss:$12 sps:$4 sm:$0xff]  }
  0x98   : > { %1183 = vmatprep.subr.bf16.mxu1 %v1972_v45  ;;  %v263_v45 = vld [vmem:[#allocation2 + $0xa0] sm:$0x1f] }
  0x9a   : > { %1123 = vmatpush2.bf16.msra.mxu0 %v1974_v50  ;;  %v2534_v50 = vpack.c.bf16 %v263_v45, %v263_v45 }
  0x9b   : > { %1184 = vmatpush2.bf16.msra.mxu1 %v1975_v51  ;;  %1124 = vmatprep.subr.bf16.mxu0 %v1976_v52  ;;  %v2536_v51 = vpack.c.bf16 %v265_v46, %v265_v46  ;;  %v2027_v52 = vld [vmem:[%s2414_s22 + $0x334] ss:$12 sps:$4 sm:$0xff]  }
  0x9c   : > { %1185 = vmatprep.subr.bf16.mxu1 %v1978_v55  ;;  %v2028_v55 = vld [vmem:[%s2414_s22 + $0xf8] ss:$12 sps:$4 sm:$0xff]  }
  0x9e   : > { %1125 = vmatpush2.bf16.msra.mxu0 %v1980_v56  ;;  %v2025_v56 = vld [vmem:[%s2414_s22 + $0x330] ss:$12 sps:$4 sm:$0xff]  }
  0x9f   : > { %1186 = vmatpush2.bf16.msra.mxu1 %v1981_v57  ;;  %1126 = vmatprep.subr.bf16.mxu0 %v1982_v58  ;;  %v2029_v57 = vld [vmem:[%s2414_s22 + $0x38] ss:$12 sps:$4 sm:$0xff]   ;;  %v2032_v58 = vld [vmem:[%s2414_s22 + $0x31c] ss:$12 sps:$4 sm:$0xff]  }
  0xa0   : > { %1187 = vmatprep.subr.bf16.mxu1 %v1984_v59  ;;  %v2033_v59 = vld [vmem:[%s2414_s22 + $0xe0] ss:$12 sps:$4 sm:$0xff]  }
  0xa2   : > { %1127 = vmatpush2.bf16.msra.mxu0 %v1986_v60  ;;  %v2224_v60 = vmov 0  }
  0xa3   : > { %1188 = vmatpush2.bf16.msra.mxu1 %v1987_v61  ;;  %1128 = vmatprep.subr.bf16.mxu0 %v1988_v62  ;;  %v2030_v61 = vld [vmem:[%s2414_s22 + $0x318] ss:$12 sps:$4 sm:$0xff]   ;;  %v2034_v62 = vld [vmem:[%s2414_s22 + $0x20] ss:$12 sps:$4 sm:$0xff]  }
  0xa4   : > { %1189 = vmatprep.subr.bf16.mxu1 %v1990_v63  ;;  %v2037_v63 = vld [vmem:[%s2414_s22 + $0x304] ss:$12 sps:$4 sm:$0xff]  }
  0xa6   : > { %1129 = vmatpush2.bf16.msra.mxu0 %v1992_v0  ;;  %v2038_v0 = vld [vmem:[%s2414_s22 + $0xc8] ss:$12 sps:$4 sm:$0xff]  }
  0xa7   : > { %1190 = vmatpush2.bf16.msra.mxu1 %v1993_v1  ;;  %1130 = vmatprep.subr.bf16.mxu0 %v1994_v2  ;;  %v2035_v1 = vld [vmem:[%s2414_s22 + $0x300] ss:$12 sps:$4 sm:$0xff]   ;;  %v2039_v2 = vld [vmem:[%s2414_s22 + $0x8] ss:$12 sps:$4 sm:$0xff]  }
  0xa8   : > { %1191 = vmatprep.subr.bf16.mxu1 %v1996_v3  ;;  %v247_v3 = vld [vmem:[#allocation2 + $0x20] sm:$0xff] }
  0xaa   : > { %1131 = vmatpush2.bf16.msra.mxu0 %v1998_v4  ;;  %v2040_v4 = vld [vmem:[%s2414_s22 + $0x2f0] ss:$12 sps:$4 sm:$0xff]  }
  0xab   : > { %1192 = vmatpush2.bf16.msra.mxu1 %v1999_v5  ;;  %1222 = vmatprep.subr.bf16.mxu0 %v2002_v10  ;;  %v2044_v10 = vld [vmem:[%s2414_s22 + $0x218] ss:$12 sps:$4 sm:$0xff]  }
  0xac   : > { %1719 = vmatprep.subr.bf16.mxu1 %v2003_v11  ;;  %v2045_v11 = vld [vmem:[%s2414_s22 + $0x398] ss:$12 sps:$4 sm:$0xff]  }
  0xad   : > { %1133 = vmatmul.mubr.bf16.vlgmr.msra.gmra.mxu0 %v2493_v16 }
  0xae   : > { %1194 = vmatmul.mubr.bf16.vlgmr.msra.gmra.mxu1 %v2495_v17  ;;  %1223 = vmatpush1.bf16.msra.mxu0 %v2000_v13  ;;  %v262_v13 = vld [vmem:[#allocation2 + $0x98] sm:$0xff] }
  0xaf   : > { %1720 = vmatpush3.bf16.msra.mxu1 %v2004_v19  ;;  %1224 = vmatprep.subr.bf16.mxu0 %v2007_v20  ;;  %v277_v15 = vpack.c.bf16 %v262_v13, %v257_v12  ;;  %v2049_v19 = vld [vmem:[%s2414_s22 + $0x2a8] ss:$12 sps:$4 sm:$0xff]  }
  0xb0   : > { %1721 = vmatprep.subr.bf16.mxu1 %v2008_v21  ;;  %1142 = vmatprep.mubr.bf16.mxu0 %v2502_v24  ;;  %v2050_v20 = vld [vmem:[%s2414_s22 + $0x1e8] ss:$12 sps:$4 sm:$0xff]  }
  0xb1   : > { %1203 = vmatprep.mubr.bf16.mxu1 %v2504_v26  ;;  %v2051_v21 = vld [vmem:[%s2414_s22 + $0x368] ss:$12 sps:$4 sm:$0xff]  }
  0xb2   : > { %1225 = vmatpush1.bf16.msra.mxu0 %v2005_v22  ;;  %v267_v22 = vld [vmem:[#allocation2 + $0xc0] sm:$0x1f] }
  0xb3   : > { %1722 = vmatpush3.bf16.msra.mxu1 %v2009_v23  ;;  %1226 = vmatprep.subr.bf16.mxu0 %v2012_v27  ;;  %v2052_v23 = vld [vmem:[%s2414_s22 + $0x290] ss:$12 sps:$4 sm:$0xff]  }
  0xb4   : > { %1723 = vmatprep.subr.bf16.mxu1 %v2013_v31  ;;  %v2054_v27 = vld [vmem:[%s2414_s22 + $0x350] ss:$12 sps:$4 sm:$0xff]   ;;  %v2058_v31 = vld [vmem:[%s2414_s22 + $0x260] ss:$12 sps:$4 sm:$0xff]  }
  0xb5   : > { %1143 = vmatmul.mubr.bf16.gmra.mxu0 %v2513_v34 }
  0xb6   : > { %1204 = vmatmul.mubr.bf16.gmra.mxu1 %v2515_v35  ;;  %1227 = vmatpush1.bf16.msra.mxu0 %v2010_v32  ;;  %v2059_v32 = vld [vmem:[%s2414_s22 + $0x1a0] ss:$12 sps:$4 sm:$0xff]  }
  0xb7   : > { %1724 = vmatpush3.bf16.msra.mxu1 %v2014_v37  ;;  %1228 = vmatprep.subr.bf16.mxu0 %v2017_v38  ;;  %v2063_v37 = vld [vmem:[%s2414_s22 + $0x308] ss:$12 sps:$4 sm:$0xff]  }
  0xb8   : > { %1725 = vmatprep.subr.bf16.mxu1 %v2018_v39  ;;  %1152 = vmatprep.mubr.bf16.mxu0 %v2522_v42 }
  0xb9   : > { %1213 = vmatprep.mubr.bf16.mxu1 %v2524_v43 }
  0xba   : > { %1229 = vmatpush1.bf16.msra.mxu0 %v2015_v40 }
  0xbb   : > { %1726 = vmatpush3.bf16.msra.mxu1 %v2019_v41  ;;  %1230 = vmatprep.subr.bf16.mxu0 %v2022_v44 }
  0xbc   : > { %1727 = vmatprep.subr.bf16.mxu1 %v2023_v47 }
  0xbd   : > { %1153 = vmatmul.mubr.bf16.gmra.mxu0 %v2534_v50 }
  0xbe   : > { %1214 = vmatmul.mubr.bf16.gmra.mxu1 %v2536_v51  ;;  %1231 = vmatpush1.bf16.msra.mxu0 %v2020_v48 }
  0xbf   : > { %1728 = vmatpush3.bf16.msra.mxu1 %v2024_v49  ;;  %1232 = vmatprep.subr.bf16.mxu0 %v2027_v52 }
  0xc0   : > { %1729 = vmatprep.subr.bf16.mxu1 %v2028_v55  ;;  %1254 = vmatprep.mubr.bf16.mxu0 %v2224_v60 }
  0xc1   : > { %1315 = vmatprep.mubr.bf16.mxu1 %v2469_v53  ;;  %v252_v53 = vld [vmem:[#allocation2 + $0x48] sm:$0xff] }
  0xc2   : > { %1233 = vmatpush1.bf16.msra.mxu0 %v2025_v56  ;;  %v2554_v5 = vpack.c.bf16 %v252_v53, %v247_v3 }
  0xc3   : > { %1730 = vmatpush3.bf16.msra.mxu1 %v2029_v57  ;;  %1234 = vmatprep.subr.bf16.mxu0 %v2032_v58 }
  0xc4   : > { %1731 = vmatprep.subr.bf16.mxu1 %v2033_v59  ;;  %v2612_v59 = vld [vmem:[%s211_s28] sm:$0x7] }
  0xc6   : > { %1235 = vmatpush1.bf16.msra.mxu0 %v2030_v61 }
  0xc7   : > { %1732 = vmatpush3.bf16.msra.mxu1 %v2034_v62  ;;  %1236 = vmatprep.subr.bf16.mxu0 %v2037_v63 }
  0xc8   : > { %1733 = vmatprep.subr.bf16.mxu1 %v2038_v0 }
  0xca   : > { %1237 = vmatpush1.bf16.msra.mxu0 %v2035_v1 }
  0xcb   : > { %1734 = vmatpush3.bf16.msra.mxu1 %v2039_v2  ;;  %1753 = vmatprep.subr.bf16.mxu0 %v2040_v4 }
  0xcc   : > { %1798 = vmatprep.subr.bf16.mxu1 %v2225_v8 }
  0xcd   : > { %1255 = vmatmul.mubr.bf16.vlgmr.msra.gmra.mxu0 %v2554_v5 }
  0xce   : > { %1316 = vmatmul.mubr.bf16.vlgmr.msra.gmra.mxu1 %v2493_v16  ;;  %1754 = vmatpush3.bf16.msra.mxu0 %v2041_v6  ;;  %v2048_v16 = vld [vmem:[%s2414_s22 + $0x380] ss:$12 sps:$4 sm:$0xff]  }
  0xcf   : > { %1799 = vmatpush3.bf16.msra.mxu1 %v2042_v7  ;;  %1755 = vmatprep.subr.bf16.mxu0 %v2043_v9 }
  0xd0   : > { %1800 = vmatprep.subr.bf16.mxu1 %v2225_v8  ;;  %1264 = vmatprep.mubr.bf16.mxu0 %v2224_v60 }
  0xd1   : > { %1323 = vmatprep.mubr.bf16.mxu1 %v2502_v24  ;;  %v282_v24 = vpack.c.bf16 %v267_v22, %v267_v22 }
  0xd2   : > { %1756 = vmatpush3.bf16.msra.mxu0 %v2044_v10 }
  0xd3   : > { %1801 = vmatpush3.bf16.msra.mxu1 %v2045_v11  ;;  %1757 = vmatprep.subr.bf16.mxu0 %v2046_v14 }
  0xd4   : > { %1802 = vmatprep.subr.bf16.mxu1 %v2225_v8 }
  0xd5   : > { %1265 = vmatmul.mubr.bf16.gmra.mxu0 %v277_v15 }
  0xd6   : > { %1324 = vmatmul.mubr.bf16.gmra.mxu1 %v2513_v34  ;;  %1758 = vmatpush3.bf16.msra.mxu0 %v2047_v18  ;;  %v2061_v34 = vld [vmem:[%s2414_s22 + $0x248] ss:$12 sps:$4 sm:$0xff]  }
  0xd7   : > { %1803 = vmatpush3.bf16.msra.mxu1 %v2048_v16  ;;  %1759 = vmatprep.subr.bf16.mxu0 %v2049_v19 }
  0xd8   : > { %1804 = vmatprep.subr.bf16.mxu1 %v2225_v8  ;;  %1274 = vmatprep.mubr.bf16.mxu0 %v2224_v60 }
  0xd9   : > { %1331 = vmatprep.mubr.bf16.mxu1 %v2522_v42 }
  0xda   : > { %1760 = vmatpush3.bf16.msra.mxu0 %v2050_v20 }
  0xdb   : > { %1805 = vmatpush3.bf16.msra.mxu1 %v2051_v21  ;;  %1761 = vmatprep.subr.bf16.mxu0 %v2052_v23 }
  0xdc   : > { %1806 = vmatprep.subr.bf16.mxu1 %v2225_v8 }
  0xdd   : > { %1275 = vmatmul.mubr.bf16.gmra.mxu0 %v282_v24 }
  0xde   : > { %1332 = vmatmul.mubr.bf16.gmra.mxu1 %v2534_v50  ;;  %1762 = vmatpush3.bf16.msra.mxu0 %v2053_v25 }
  0xdf   : > { %1807 = vmatpush3.bf16.msra.mxu1 %v2054_v27  ;;  %1763 = vmatprep.subr.bf16.mxu0 %v2055_v28 }
  0xe0   : > { %1808 = vmatprep.subr.bf16.mxu1 %v2225_v8  ;;  %1371 = vmatprep.mubr.bf16.mxu0 %v2471_v54 }
  0xe1   : > { %1814 = vmatprep.mubr.msk.bf16.mxu1 %vm2226_vm0, %v2225_v8 }
  0xe2   : > { %1764 = vmatpush3.bf16.msra.mxu0 %v2056_v29 }
  0xe3   : > { %1809 = vmatpush3.bf16.msra.mxu1 %v2057_v30  ;;  %1765 = vmatprep.subr.bf16.mxu0 %v2058_v31 }
  0xe4   : > { %1810 = vmatprep.subr.bf16.mxu1 %v2225_v8 }
  0xe6   : > { %1766 = vmatpush3.bf16.msra.mxu0 %v2059_v32 }
  0xe7   : > { %1811 = vmatpush3.bf16.msra.mxu1 %v2060_v33  ;;  %1767 = vmatprep.subr.bf16.mxu0 %v2061_v34 }
  0xe8   : > { %1812 = vmatprep.subr.bf16.mxu1 %v2225_v8 }
  0xea   : > { %1768 = vmatpush3.bf16.msra.mxu0 %v2062_v36 }
  0xeb   : > { %1813 = vmatpush3.bf16.msra.mxu1 %v2063_v37 }
  0xed   : > { %1372 = vmatmul.mubr.bf16.vlgmr.msra.gmra.mxu0 %v2495_v17 }
  0xee   : > { %1815 = vmatmul.mubr.bf16.vlgmr.msra.gmra.mxu1 %v2554_v5  ;;  %1379 = vmatprep.mubr.bf16.mxu0 %v2504_v26 }
  0xef   : > { %1818 = vmatprep.mubr.msk.bf16.mxu1 %vm2226_vm0, %v2225_v8 }
  0xf5   : > { %1380 = vmatmul.mubr.bf16.gmra.mxu0 %v2515_v35 }
  0xf6   : > { %1819 = vmatmul.mubr.bf16.gmra.mxu1 %v277_v15  ;;  %1387 = vmatprep.mubr.bf16.mxu0 %v2524_v43  ;;  %v445_v43 = vlaneseq }
  0xf7   : > { %1822 = vmatprep.mubr.msk.bf16.mxu1 %vm2226_vm0, %v2225_v8 }
  0xfd   : > { %1388 = vmatmul.mubr.bf16.gmra.mxu0 %v2536_v51  ;;  %v2607_v51 = vshrl.u32 %v445_v43, 7 }
  0xfe   : > { %1823 = vmatmul.mubr.bf16.gmra.mxu1 %v282_v24 }
  0xff   : > { %v447_v58 = vsub.s32 0, %v2607_v51  ;;  %v451_v62 = vsub.s32 1, %v2607_v51 }
 0x101   : > { %v448_v1 = vrot.slane %v2612_v59, %v447_v58  ;;  %v452_v2 = vrot.slane %v2612_v59, %v451_v62 }
 0x16d   : > { %v1134_v54 = vpop.f32.mrf.mxu0 }
 0x16e   : > { %v1195_v17 = vpop.f32.mrf.mxu1  ;;  %v1135_v3 = vadd.f32 %v1134_v54, %v448_v1 }
 0x16f   : > { %v1136_v38 = vpop.f32.mrf.mxu0 }
 0x170   : > { %v1197_v39 = vpop.f32.mrf.mxu1  ;;  %v1137_v53 = vadd.f32 %v1136_v38, %v452_v2  ;;  %v1196_v4 = vadd.f32 %v1195_v17, %v1135_v3 }
 0x171   : > { %v1138_v26 = vpop.f32.mrf.mxu0 }
 0x172   : > { %v1199_v40 = vpop.f32.mrf.mxu1  ;;  %v1139_v5 = vadd.f32 %v1138_v26, %v448_v1  ;;  %v1198_v8 = vadd.f32 %v1197_v39, %v1137_v53 }
 0x173   : > { %v1140_v41 = vpop.f32.mrf.mxu0 }
 0x174   : > { %v1201_v42 = vpop.f32.mrf.mxu1  ;;  %v1141_v9 = vadd.f32 %v1140_v41, %v452_v2  ;;  %v1200_v13 = vadd.f32 %v1199_v40, %v1139_v5 }
 0x175   : > { %v1144_v44 = vpop.f32.mrf.mxu0 }
 0x176   : > { %v1205_v35 = vpop.f32.mrf.mxu1  ;;  %v1145_v14 = vadd.f32 %v1144_v44, %v448_v1  ;;  %v1202_v19 = vadd.f32 %v1201_v42, %v1141_v9 }
 0x177   : > { %v1146_v45 = vpop.f32.mrf.mxu0 }
 0x178   : > { %v1207_v46 = vpop.f32.mrf.mxu1  ;;  %v1147_v20 = vadd.f32 %v1146_v45, %v452_v2  ;;  %v1206_v24 = vadd.f32 %v1205_v35, %v1145_v14 }
 0x179   : > { %v1148_v47 = vpop.f32.mrf.mxu0 }
 0x17a   : > { %v1209_v48 = vpop.f32.mrf.mxu1  ;;  %v1149_v25 = vadd.f32 %v1148_v47, %v448_v1  ;;  %v1208_v30 = vadd.f32 %v1207_v46, %v1147_v20 }
 0x17b   : > { %v1150_v49 = vpop.f32.mrf.mxu0 }
 0x17c   : > { %v1211_v50 = vpop.f32.mrf.mxu1  ;;  %v1151_v31 = vadd.f32 %v1150_v49, %v452_v2  ;;  %v1210_v36 = vadd.f32 %v1209_v48, %v1149_v25 }
 0x17d   : > { %v1154_v52 = vpop.f32.mrf.mxu0 }
 0x17e   : > { %v1215_v55 = vpop.f32.mrf.mxu1  ;;  %v1155_v37 = vadd.f32 %v1154_v52, %v448_v1  ;;  %v1212_v39 = vadd.f32 %v1211_v50, %v1151_v31 }
 0x17f   : > { %v1156_v56 = vpop.f32.mrf.mxu0 }
 0x180   : > { %v2609_v57 = vpop.f32.mrf.mxu1  ;;  %v1157_v26 = vadd.f32 %v1156_v56, %v452_v2  ;;  %v1216_v44 = vadd.f32 %v1215_v55, %v1155_v37 }
 0x181   : > { %v1158_v60 = vpop.f32.mrf.mxu0 }
 0x182   : > { %v1219_v61 = vpop.f32.mrf.mxu1  ;;  %v1218_v43 = vadd.f32 %v2609_v57, %v1157_v26 }
 0x183   : > { %v1159_v63 = vpop.f32.mrf.mxu0  ;;  %v455_v61 = vsub.s32 2, %v2607_v51 }
 0x184   : > { %v1220_v0 = vpop.f32.mrf.mxu1 }
 0x185   : > { %v456_v55 = vrot.slane %v2612_v59, %v455_v61 }
 0x18d   : > { %v1256_v6 = vpop.f32.mrf.mxu0 }
 0x18e   : > { %v1735_v7 = vpop.f32.mrf.mxu1  ;;  %v1257_v10 = vadd.f32 %v1256_v6, %v1196_v4 }
 0x18f   : > { %v1258_v11 = vpop.f32.mrf.mxu0 }
 0x190   : > { %v1736_v12 = vpop.f32.mrf.mxu1  ;;  %1451 = vst [vmem:[%s2618_s17] sm:$0xff] %v1257_v10  ;;  %v1259_v15 = vadd.f32 %v1258_v11, %v1198_v8 }
 0x191   : > { %v1260_v18 = vpop.f32.mrf.mxu0  ;;  %v1737_v62 = vadd.f32 %v1736_v12, %v1735_v7 }
 0x192   : > { %v1738_v16 = vpop.f32.mrf.mxu1  ;;  %1452 = vst [vmem:[%s2618_s17 + $0x8] sm:$0xff] %v1259_v15  ;;  %v1261_v21 = vadd.f32 %v1260_v18, %v1200_v13 }
 0x193   : > { %v1262_v22 = vpop.f32.mrf.mxu0  ;;  %v1318_v2 = vadd.f32 %v1737_v62, %v456_v55 }
 0x194   : > { %v1739_v23 = vpop.f32.mrf.mxu1  ;;  %1454 = vst [vmem:[%s2618_s17 + $0x18] sm:$0xff] %v1261_v21  ;;  %v1263_v27 = vadd.f32 %v1262_v22, %v1202_v19 }
 0x195   : > { %v1266_v28 = vpop.f32.mrf.mxu0  ;;  %v1740_v3 = vadd.f32 %v1739_v23, %v1738_v16 }
 0x196   : > { %v1741_v29 = vpop.f32.mrf.mxu1  ;;  %1455 = vst [vmem:[%s2618_s17 + $0x20] sm:$0xff] %v1263_v27  ;;  %v1267_v32 = vadd.f32 %v1266_v28, %v1206_v24 }
 0x197   : > { %v1268_v33 = vpop.f32.mrf.mxu0  ;;  %v1321_v10 = vadd.f32 %v1740_v3, %v456_v55 }
 0x198   : > { %v1742_v34 = vpop.f32.mrf.mxu1  ;;  %1457 = vst [vmem:[%s2618_s17 + $0x30] sm:$0xff] %v1267_v32  ;;  %v1269_v54 = vadd.f32 %v1268_v33, %v1208_v30 }
 0x199   : > { %v1270_v17 = vpop.f32.mrf.mxu0  ;;  %v1743_v11 = vadd.f32 %v1742_v34, %v1741_v29 }
 0x19a   : > { %v1744_v38 = vpop.f32.mrf.mxu1  ;;  %1458 = vst [vmem:[%s2618_s17 + $0x38] sm:$0xff] %v1269_v54  ;;  %v1271_v40 = vadd.f32 %v1270_v17, %v1210_v36 }
 0x19b   : > { %v1272_v41 = vpop.f32.mrf.mxu0  ;;  %v1326_v18 = vadd.f32 %v1743_v11, %v456_v55 }
 0x19c   : > { %v1745_v42 = vpop.f32.mrf.mxu1  ;;  %1460 = vst [vmem:[%s2618_s17 + $0x48] sm:$0xff] %v1271_v40  ;;  %v1273_v35 = vadd.f32 %v1272_v41, %v1212_v39 }
 0x19d   : > { %v1276_v45 = vpop.f32.mrf.mxu0  ;;  %v1746_v16 = vadd.f32 %v1745_v42, %v1744_v38 }
 0x19e   : > { %v1747_v46 = vpop.f32.mrf.mxu1  ;;  %1461 = vst [vmem:[%s2618_s17 + $0x50] sm:$0xff] %v1273_v35  ;;  %v1277_v47 = vadd.f32 %v1276_v45, %v1216_v44 }
 0x19f   : > { %v1278_v48 = vpop.f32.mrf.mxu0  ;;  %v1329_v27 = vadd.f32 %v1746_v16, %v456_v55 }
 0x1a0   : > { %v1748_v49 = vpop.f32.mrf.mxu1  ;;  %1463 = vst [vmem:[%s2618_s17 + $0x60] sm:$0x1f] %v1277_v47  ;;  %v1279_v50 = vadd.f32 %v1278_v48, %v1218_v43 }
 0x1a1   : > { %v1280_v52 = vpop.f32.mrf.mxu0  ;;  %v1749_v28 = vadd.f32 %v1748_v49, %v1747_v46 }
 0x1a2   : > { %v1750_v56 = vpop.f32.mrf.mxu1  ;;  %1464 = vst [vmem:[%s2618_s17 + $0x68] sm:$0x1f] %v1279_v50 }
 0x1a3   : > { %v1281_v58 = vpop.f32.mrf.mxu0  ;;  %v1334_v37 = vadd.f32 %v1749_v28, %v456_v55 }
 0x1a4   : > { %v1751_v60 = vpop.f32.mrf.mxu1 }
 0x1ad   : > { %v1769_v63 = vpop.f32.mrf.mxu0 }
 0x1ae   : > { %v1429_v0 = vpop.f32.mrf.mxu1 }
 0x1af   : > { %v1770_v1 = vpop.f32.mrf.mxu0 }
 0x1b0   : > { %v1816_v57 = vpop.f32.mrf.mxu1  ;;  %v1771_v53 = vadd.f32 %v1770_v1, %v1769_v63 }
 0x1b1   : > { %v1772_v4 = vpop.f32.mrf.mxu0 }
 0x1b2   : > { %v1432_v5 = vpop.f32.mrf.mxu1  ;;  %v1374_v6 = vadd.f32 %v1771_v53, %v1318_v2 }
 0x1b3   : > { %v1773_v8 = vpop.f32.mrf.mxu0 }
 0x1b4   : > { %v1817_v9 = vpop.f32.mrf.mxu1  ;;  %v1430_v51 = vadd.f32 %v1429_v0, %v1374_v6  ;;  %v1774_v13 = vadd.f32 %v1773_v8, %v1772_v4 }
 0x1b5   : > { %v1775_v59 = vpop.f32.mrf.mxu0 }
 0x1b6   : > { %v1437_v7 = vpop.f32.mrf.mxu1  ;;  %1453 = vst [vmem:[%s2618_s17 + $0x10] sm:$0xff] %v1430_v51  ;;  %v1377_v12 = vadd.f32 %v1774_v13, %v1321_v10 }
 0x1b7   : > { %v1776_v14 = vpop.f32.mrf.mxu0 }
 0x1b8   : > { %v1820_v15 = vpop.f32.mrf.mxu1  ;;  %v1433_v19 = vadd.f32 %v1432_v5, %v1377_v12  ;;  %v1777_v20 = vadd.f32 %v1776_v14, %v1775_v59 }
 0x1b9   : > { %v1778_v21 = vpop.f32.mrf.mxu0 }
 0x1ba   : > { %v1440_v22 = vpop.f32.mrf.mxu1  ;;  %1456 = vst [vmem:[%s2618_s17 + $0x28] sm:$0xff] %v1433_v19  ;;  %v1382_v23 = vadd.f32 %v1777_v20, %v1326_v18 }
 0x1bb   : > { %v1779_v24 = vpop.f32.mrf.mxu0 }
 0x1bc   : > { %v1821_v25 = vpop.f32.mrf.mxu1  ;;  %v1438_v29 = vadd.f32 %v1437_v7, %v1382_v23  ;;  %v1780_v30 = vadd.f32 %v1779_v24, %v1778_v21 }
 0x1bd   : > { %v1781_v31 = vpop.f32.mrf.mxu0 }
 0x1be   : > { %v1445_v32 = vpop.f32.mrf.mxu1  ;;  %1459 = vst [vmem:[%s2618_s17 + $0x40] sm:$0xff] %v1438_v29  ;;  %v1385_v33 = vadd.f32 %v1780_v30, %v1329_v27 }
 0x1bf   : > { %v1782_v34 = vpop.f32.mrf.mxu0 }
 0x1c0   : > { %v1824_v36 = vpop.f32.mrf.mxu1  ;;  %v1441_v54 = vadd.f32 %v1440_v22, %v1385_v33  ;;  %v1783_v17 = vadd.f32 %v1782_v34, %v1781_v31 }
 0x1c1   : > { %v1784_v38 = vpop.f32.mrf.mxu0 }
 0x1c2   : > { %v1448_v39 = vpop.f32.mrf.mxu1  ;;  %1462 = vst [vmem:[%s2618_s17 + $0x58] sm:$0xff] %v1441_v54  ;;  %v1390_v26 = vadd.f32 %v1783_v17, %v1334_v37 }
 0x1c3   : > { %v1785_v40 = vpop.f32.mrf.mxu0 }
 0x1c4   : > { %v1825_v41 = vpop.f32.mrf.mxu1  ;;  %v1446_v42 = vadd.f32 %v1445_v32, %v1390_v26 }
 0x1c6   : > { %1465 = vst [vmem:[%s2618_s17 + $0x70] sm:$0x1f] %v1446_v42 }
 0x1c7   : > { %2159 = shalt.err (!%p2156_p9)
}
 0x1c8   : > { %s2160_s8 = scalar_lea.hbm %s2642_s10, 1920  ;;  %s2164_s23 = scalar_lea.hbm %s2690_s3, 9600 }
 0x1c9   : > { %p2161_p7 = scmp.ne.s32.totalorder %s2642_s10, %s2160_s8  ;;  %p2165_p11 = scmp.lt.s32.totalorder %s2642_s10, %s2690_s3 }
 0x1ca   : > { %p2166_p3 = scmp.lt.s32.totalorder %s2164_s23, %s2160_s8 }
 0x1cb   : > { %p2162_p4 = pnand %p2161_p7, %p2711_p8 }
 0x1cc   : > { %p2167_p5 = por %p2166_p3, %p2165_p11 }
 0x1cd   : > { %p2163_p12 = pneg %p2162_p4 }
 0x1cf   : > { %p2168_p2 = pnand %p2167_p5, %p2163_p12 }
 0x1d1   : > { %2171 = shalt.err (!%p2168_p2)
}
 0x1d2   : > { %s2228_s30 = smov 384   ;;  %s2229_s28 = smov 1920  }
 0x1d3   : > { %s2230_s4 = smov 24  }
 0x1d4   : > { %1839 = dma.vmem_to_hbm [thread:$0]  (%p2711_p8), %s2644_s26, 1920, %s2642_s10, %s1467_s25, %s2228_s30, %s2229_s28, %s2230_s4  }
 0x1d5 PF: > { %p1859_p13 = scmp.ge.s32.totalorder %s2214_s15, 2  ;;  %s1495_s17 = sand.u32 1, %s2202_s12  }
 0x1d6   : > { %p2712_p1 = scmp.ne.s32.totalorder %s2702_s29, 0  ;;  %s1496_s24 = scalar_lea.sflag [#allocation4], %s1495_s17 }
 0x1d8   : > { %p1853_p6 = pnand %p1859_p13, %p2712_p1 }
 0x1da   : > { %p1854_p0 = pneg %p1853_p6 }
 0x1dc   : > { %2197 = dma.done.wait (%p1854_p0), %s1496_s24, 1920  }
 0x1dd   : > { %2199 = vsyncadd (%p1854_p0), %s1496_s24, 4294965376  ;;  %s2713_s5 = sld [smem:[#allocation12_spill]]  ;;  %p17_p10 = scmp.ge.s32.totalorder %s2272_s16, 7  }
 0x1de   : > { %s2714_s12 = smov %s2206_s13  ;;  %s2715_s13 = smov %s2210_s14 }
 0x1df   : > { %s2717_s15 = smov %s2272_s16  ;;  %19 = sbr.rel (!%p17_p10) target bundleno = 8 (0x8), region = 93 }
 0x1e3   : > { %s2716_s14 = smov %s2713_s5 }
 0x1e4   :  { %1501 = vsyncpa [#allocation3], 1 }
 0x1e5   :  { %1503 = vsyncpa [#allocation3 + $0x1], 1 }
 0x1e6   :  { %1504 = vsyncpa [#allocation6], 1 }
 0x1e7   :  { %1506 = vsyncpa [#allocation6 + $0x1], 1 }
 0x1e8   :  { %1507 = vsyncpa [#allocation4], 1 }
 0x1e9   :  { %1509 = vsyncpa [#allocation4 + $0x1], 1 }

</bundles_post_ra>
